<compile_context>
chip_gen: v7x
topology: tpu7x:2x2x1
jax: 0.10.0
libtpu: 0.0.40
codegen_flags: <defaults>
</compile_context>

<pallas_src>
import functools

import jax
import jax.numpy as jnp
from jax.experimental import pallas as pl
from jax.experimental.pallas import tpu as pltpu


def _superposition_kernel(
    superposition_dim, action_dim,
    obs_ref,
    w1, b1, w2, b2, w3, b3,      # feature extractor (3 x Linear+ReLU, dropout=identity)
    wf, bf,                      # fused [F, C+K+S*A] = [wc1 | wk1_f | wd], fused bias
    wk1d,                        # [S*A, C+K]  (zeros in first C cols | wk1_d)
    w2nd, b2nd,                  # block-diag [C+K, S+1] = [[wc2,0],[0,wk2]], [bc2|bk2]
    sel,                         # [S*A, S] 0/1 block-diagonal entropy selector (hoisted)
    out_ref,                     # [TB, OUT_W] packed lane-dense output slab
):
    f32 = jnp.float32
    S, A = superposition_dim, action_dim
    SA = S * A
    CK = wk1d.shape[1]           # C + K (= 128 for the default module)

    x = obs_ref[...]

    def linear(v, w_ref, b_ref):
        # bf16-stored weights promote to f32; accumulate in f32.
        return jnp.dot(v, w_ref[...], preferred_element_type=f32) + b_ref[...]

    # ---- feature extractor: (Linear -> ReLU -> Dropout[identity]) x 3 ----
    h = jnp.maximum(linear(x, w1, b1), 0.0)
    h = jnp.maximum(linear(h, w2, b2), 0.0)
    feats = jnp.maximum(linear(h, w3, b3), 0.0)                  # [TB, F]

    # ---- single fused matmul for all consumers of `feats` ----
    fused = linear(feats, wf, bf)                                # [TB, CK + SA]
    ck_pre = fused[:, :CK]                                       # conf-1 | cons-1 pre-act
    dec = fused[:, CK:CK + SA]                                   # decision logits [TB, SA]

    # ---- fused hidden of confidence-1 / consistency-1 ----
    # wk1d has zero columns for the confidence half, so this add is a no-op there.
    ck_h = jnp.maximum(
        ck_pre + jnp.dot(dec, wk1d[...], preferred_element_type=f32), 0.0)

    # ---- block-diagonal fused layer-2: conf logits (0..S-1) + cons pre-sigmoid (S) ----
    small = jnp.dot(ck_h, w2nd[...], preferred_element_type=f32) + b2nd[...]
    c_logits = small[:, :S]
    cons = jax.nn.sigmoid(small[:, S:S + 1])                     # [TB, 1]

    # ---- confidence softmax (exact reciprocal; tiny width) ----
    c_m = jnp.max(c_logits, axis=-1, keepdims=True)
    c_e = jnp.exp(c_logits - c_m)
    conf = c_e / jnp.sum(c_e, axis=-1, keepdims=True)            # [TB, S]

    # ---- per-head entropy, vectorized via the hoisted block-diag selector ----
    # Per-HEAD max shift (not a global row max) so no head underflows.
    shifted_parts = []
    for i in range(S):
        d_i = dec[:, i * A:(i + 1) * A]
        shifted_parts.append(d_i - jnp.max(d_i, axis=-1, keepdims=True))
    shifted = jnp.concatenate(shifted_parts, axis=-1)            # [TB, SA]
    e = jnp.exp(shifted)
    sel_m = sel[...]
    z = jnp.dot(e, sel_m, preferred_element_type=f32)            # per-head Z (>= 1)
    w_sum = jnp.dot(e * shifted, sel_m, preferred_element_type=f32)
    dent = jnp.log(z) - w_sum / z                                # [TB, S] per-head entropy
    # sum_i conf_i*dent_i + 0.1 * (-sum_i conf_i*log(conf_i+1e-8))   (one reduce)
    ent = jnp.sum(conf * (dent - 0.1 * jnp.log(conf + 1e-8)),
                  axis=-1, keepdims=True)                        # [TB, 1]

    # ---- pack everything into one lane-dense slab -> single unmasked store ----
    TB = dec.shape[0]
    pad = out_ref.shape[1] - (SA + S + 2)
    pieces = [dec, conf, ent, cons]
    if pad > 0:
        pieces.append(jnp.zeros((TB, pad), f32))
    out_ref[...] = jnp.concatenate(pieces, axis=1)


def pack_params(params, *, superposition_dim, action_dim, weight_dtype=jnp.bfloat16):
    """Repackage module-faithful params into the fused/split kernel layout (host-side)."""
    (w1, b1, w2, b2, w3, b3, wd, bd, wc1, bc1, wc2, bc2, wk1, bk1, wk2, bk2) = params
    S, A = superposition_dim, action_dim
    F = w3.shape[1]
    C = wc1.shape[1]
    K = wk1.shape[1]
    f32 = jnp.float32

    wk1_f, wk1_d = wk1[:F], wk1[F:]
    # fused feats-consumer weight: [F, C + K + S*A]
    wf = jnp.concatenate([wc1, wk1_f, wd], axis=1)
    bf_ = jnp.concatenate([bc1, bk1, bd], axis=1)
    # decision-logit half of consistency-1, zero-padded to add onto the full CK slab
    wk1d_pad = jnp.concatenate([jnp.zeros((S * A, C), f32), wk1_d], axis=1)
    # block-diagonal second-layer weight [[wc2, 0], [0, wk2]] : [C+K, S+1]
    top = jnp.concatenate([wc2, jnp.zeros((C, 1), f32)], axis=1)
    bot = jnp.concatenate([jnp.zeros((K, S), f32), wk2], axis=1)
    w2nd = jnp.concatenate([top, bot], axis=0)
    b2nd = jnp.concatenate([bc2, bk2], axis=1)
    # hoisted entropy selector: [S*A, S] block-diagonal 0/1
    r = jnp.arange(S * A) // A
    c = jnp.arange(S)
    sel = (r[:, None] == c[None, :]).astype(f32)

    cast = lambda w: w.astype(weight_dtype)
    return (cast(w1), b1, cast(w2), b2, cast(w3), b3,
            cast(wf), bf_, cast(wk1d_pad), cast(w2nd), b2nd, sel)


def superposition_forward(obs, packed_params, *, superposition_dim, action_dim,
                          batch_tile=None):
    """Returns (decision_states [B,S,A], confidence [B,S], entropy [B], consistency [B])."""
    B, obs_dim = obs.shape
    S, A = superposition_dim, action_dim
    out_w = pl.cdiv(S * A + S + 2, 128) * 128          # lane-dense packed output width

    if batch_tile is None:
        batch_tile = B if B <= 512 else 512            # v7x (64 MiB VMEM) safe default
    TB = batch_tile
    Bp = pl.cdiv(B, TB) * TB
    obs_p = obs if Bp == B else jnp.pad(obs, ((0, Bp - B), (0, 0)))

    kernel = functools.partial(_superposition_kernel, S, A)
    # Weights: full blocks with a constant index_map -> stay VMEM-resident across steps.
    weight_specs = [pl.BlockSpec(p.shape, lambda i: (0, 0)) for p in packed_params]
    in_specs = [pl.BlockSpec((TB, obs_dim), lambda i: (i, 0))] + weight_specs
    out_specs = pl.BlockSpec((TB, out_w), lambda i: (i, 0))

    out = pl.pallas_call(
        kernel,
        out_shape=jax.ShapeDtypeStruct((Bp, out_w), jnp.float32),
        grid=(Bp // TB,),
        in_specs=in_specs,
        out_specs=out_specs,
        compiler_params=pltpu.CompilerParams(
            dimension_semantics=("parallel",),
            vmem_limit_bytes=32 * 1024 * 1024),
    )(obs_p, *packed_params)

    out = out[:B]
    dec = out[:, :S * A].reshape(B, S, A)
    conf = out[:, S * A:S * A + S]
    ent = out[:, S * A + S]
    cons = out[:, S * A + S + 1]
    return dec, conf, ent, cons


# -------------------- deterministic parameter construction --------------------

def _init_linear(key, fan_in, fan_out):
    """PyTorch-style default Linear init: U(-1/sqrt(fan_in), 1/sqrt(fan_in))."""
    kw, kb = jax.random.split(key)
    bound = 1.0 / (fan_in ** 0.5)
    w = jax.random.uniform(kw, (fan_in, fan_out), jnp.float32, -bound, bound)
    b = jax.random.uniform(kb, (1, fan_out), jnp.float32, -bound, bound)
    return w, b


def make_params(key, obs_dim, action_dim, superposition_dim, hidden_dims):
    keys = jax.random.split(key, 8 + superposition_dim)
    # feature extractor
    w1, b1 = _init_linear(keys[0], obs_dim, hidden_dims[0])
    w2, b2 = _init_linear(keys[1], hidden_dims[0], hidden_dims[1])
    w3, b3 = _init_linear(keys[2], hidden_dims[1], hidden_dims[2])
    feat_dim = hidden_dims[2]
    # decision heads (fused along output axis -> [F, S*A])
    head_ws, head_bs = [], []
    for i in range(superposition_dim):
        hw, hb = _init_linear(keys[3 + i], feat_dim, action_dim)
        head_ws.append(hw)
        head_bs.append(hb)
    wd = jnp.concatenate(head_ws, axis=1)
    bd = jnp.concatenate(head_bs, axis=1)
    # confidence network
    wc1, bc1 = _init_linear(keys[3 + superposition_dim], feat_dim, 64)
    wc2, bc2 = _init_linear(keys[4 + superposition_dim], 64, superposition_dim)
    # consistency network
    wk1, bk1 = _init_linear(keys[5 + superposition_dim],
                            feat_dim + superposition_dim * action_dim, 64)
    wk2, bk2 = _init_linear(keys[6 + superposition_dim], 64, 1)
    return (w1, b1, w2, b2, w3, b3, wd, bd, wc1, bc1, wc2, bc2, wk1, bk1, wk2, bk2)


def reference_forward(obs, params, *, superposition_dim, action_dim):
    (w1, b1, w2, b2, w3, b3, wd, bd, wc1, bc1, wc2, bc2, wk1, bk1, wk2, bk2) = params
    B = obs.shape[0]
    S, A = superposition_dim, action_dim
    h = jax.nn.relu(obs @ w1 + b1)
    h = jax.nn.relu(h @ w2 + b2)
    f = jax.nn.relu(h @ w3 + b3)
    dec = f @ wd + bd                                        # [B, S*A]
    conf = jax.nn.softmax(jax.nn.relu(f @ wc1 + bc1) @ wc2 + bc2, axis=-1)
    dec3 = dec.reshape(B, S, A)
    p = jax.nn.softmax(dec3, axis=-1)
    dent = -(p * jnp.log(p + 1e-8)).sum(-1)                  # [B, S]
    ent = (dent * conf).sum(-1) + 0.1 * (-(conf * jnp.log(conf + 1e-8)).sum(-1))
    cin = jnp.concatenate([f, dec], axis=1)
    cons = jax.nn.sigmoid(jax.nn.relu(cin @ wk1 + bk1) @ wk2 + bk2)[:, 0]
    return dec3, conf, ent, cons


def _quantize_weights(params, weight_dtype=jnp.bfloat16):
    """Round weight matrices (even indices) to the kernel's storage dtype, widen to f32."""
    return tuple(p.astype(weight_dtype).astype(jnp.float32) if i % 2 == 0 else p
                 for i, p in enumerate(params))


if __name__ == "__main__":
    # Small, module-consistent shapes.
    B, OBS_DIM, ACTION_DIM, SUP_DIM = 8, 32, 8, 4
    HIDDEN_DIMS = [256, 256, 128]   # module default hidden_dims

    key = jax.random.PRNGKey(0)
    k_obs, k_params, k_obs2 = jax.random.split(key, 3)
    obs = jax.random.normal(k_obs, (B, OBS_DIM), dtype=jnp.float32)
    params = make_params(k_params, OBS_DIM, ACTION_DIM, SUP_DIM, HIDDEN_DIMS)
    kparams = pack_params(params, superposition_dim=SUP_DIM, action_dim=ACTION_DIM)
    # Reference uses the same bf16-rounded weights, so the comparison isolates kernel
    # correctness rather than bf16 quantization error.
    qparams = _quantize_weights(params)

    # --- single-block case (B=8, grid=(1,)) ---
    dec, conf, ent, cons = superposition_forward(
        obs, kparams, superposition_dim=SUP_DIM, action_dim=ACTION_DIM)
    jax.block_until_ready((dec, conf, ent, cons))

    r_dec, r_conf, r_ent, r_cons = reference_forward(
        obs, qparams, superposition_dim=SUP_DIM, action_dim=ACTION_DIM)
    assert dec.shape == (B, SUP_DIM, ACTION_DIM)
    assert conf.shape == (B, SUP_DIM)
    assert ent.shape == (B,) and cons.shape == (B,)
    # Tolerance covers TPU matmul precision defaults and the log(Z)-W/Z entropy form.
    tol = dict(rtol=1e-2, atol=1e-2)
    assert jnp.allclose(dec, r_dec, **tol)
    assert jnp.allclose(conf, r_conf, **tol)
    assert jnp.allclose(ent, r_ent, **tol)
    assert jnp.allclose(cons, r_cons, **tol)

    # --- gridded case (B=20, TB=8 -> padded to 24, grid=(3,), weights stay resident) ---
    B2 = 20
    obs2 = jax.random.normal(k_obs2, (B2, OBS_DIM), dtype=jnp.float32)
    dec2, conf2, ent2, cons2 = superposition_forward(
        obs2, kparams, superposition_dim=SUP_DIM, action_dim=ACTION_DIM, batch_tile=8)
    jax.block_until_ready((dec2, conf2, ent2, cons2))
    g_dec, g_conf, g_ent, g_cons = reference_forward(
        obs2, qparams, superposition_dim=SUP_DIM, action_dim=ACTION_DIM)
    assert dec2.shape == (B2, SUP_DIM, ACTION_DIM)
    assert jnp.allclose(dec2, g_dec, **tol)
    assert jnp.allclose(conf2, g_conf, **tol)
    assert jnp.allclose(ent2, g_ent, **tol)
    assert jnp.allclose(cons2, g_cons, **tol)

    print("KERNEL_OK")
</pallas_src>

<mosaic_0001>
module attributes {stable_mosaic.version = 11 : i64} {
  func.func @_superposition_kernel(%arg0: i32, %arg1: memref<8x32xf32, #tpu.memory_space<vmem>>, %arg2: memref<32x256xbf16, #tpu.memory_space<vmem>>, %arg3: memref<1x256xf32, #tpu.memory_space<vmem>>, %arg4: memref<256x256xbf16, #tpu.memory_space<vmem>>, %arg5: memref<1x256xf32, #tpu.memory_space<vmem>>, %arg6: memref<256x128xbf16, #tpu.memory_space<vmem>>, %arg7: memref<1x128xf32, #tpu.memory_space<vmem>>, %arg8: memref<128x160xbf16, #tpu.memory_space<vmem>>, %arg9: memref<1x160xf32, #tpu.memory_space<vmem>>, %arg10: memref<32x128xbf16, #tpu.memory_space<vmem>>, %arg11: memref<128x5xbf16, #tpu.memory_space<vmem>>, %arg12: memref<1x5xf32, #tpu.memory_space<vmem>>, %arg13: memref<32x4xf32, #tpu.memory_space<vmem>>, %arg14: memref<8x128xf32, #tpu.memory_space<vmem>>) attributes {dimension_semantics = [#tpu.dimension_semantics<parallel>], iteration_bounds = array<i64: 1>, scalar_prefetch = 0 : i64, scratch_operands = 0 : i64, tpu.core_type = #tpu.core_type<tc>, window_params = [{transform_indices = @transform_0, window_bounds = array<i64: 8, 32>}, {pipeline_mode = #tpu.pipeline_mode<synchronous>, transform_indices = @transform_1, window_bounds = array<i64: 32, 256>}, {pipeline_mode = #tpu.pipeline_mode<synchronous>, transform_indices = @transform_2, window_bounds = array<i64: 1, 256>}, {pipeline_mode = #tpu.pipeline_mode<synchronous>, transform_indices = @transform_3, window_bounds = array<i64: 256, 256>}, {pipeline_mode = #tpu.pipeline_mode<synchronous>, transform_indices = @transform_4, window_bounds = array<i64: 1, 256>}, {pipeline_mode = #tpu.pipeline_mode<synchronous>, transform_indices = @transform_5, window_bounds = array<i64: 256, 128>}, {pipeline_mode = #tpu.pipeline_mode<synchronous>, transform_indices = @transform_6, window_bounds = array<i64: 1, 128>}, {pipeline_mode = #tpu.pipeline_mode<synchronous>, transform_indices = @transform_7, window_bounds = array<i64: 128, 160>}, {pipeline_mode = #tpu.pipeline_mode<synchronous>, transform_indices = @transform_8, window_bounds = array<i64: 1, 160>}, {pipeline_mode = #tpu.pipeline_mode<synchronous>, transform_indices = @transform_9, window_bounds = array<i64: 32, 128>}, {pipeline_mode = #tpu.pipeline_mode<synchronous>, transform_indices = @transform_10, window_bounds = array<i64: 128, 5>}, {pipeline_mode = #tpu.pipeline_mode<synchronous>, transform_indices = @transform_11, window_bounds = array<i64: 1, 5>}, {pipeline_mode = #tpu.pipeline_mode<synchronous>, transform_indices = @transform_12, window_bounds = array<i64: 32, 4>}, {transform_indices = @transform_13, window_bounds = array<i64: 8, 128>}]} {
    %c0 = arith.constant 0 : index
    %c0_0 = arith.constant 0 : index
    %0 = vector.load %arg1[%c0, %c0_0] : memref<8x32xf32, #tpu.memory_space<vmem>>, vector<8x32xf32>
    %c0_1 = arith.constant 0 : index
    %c0_2 = arith.constant 0 : index
    %1 = vector.load %arg2[%c0_1, %c0_2] : memref<32x256xbf16, #tpu.memory_space<vmem>>, vector<32x256xbf16>
    %cst = arith.constant dense<0.000000e+00> : vector<8x256xf32>
    %2 = tpu.matmul %0, %1, %cst {dimension_numbers = #tpu.dot_dimension_numbers<[1], [0], [0], [1], [0, 0, 1, 1], [], []>} : vector<8x32xf32>, vector<32x256xbf16>, vector<8x256xf32> -> vector<8x256xf32>
    %c0_3 = arith.constant 0 : index
    %c0_4 = arith.constant 0 : index
    %3 = vector.load %arg3[%c0_3, %c0_4] : memref<1x256xf32, #tpu.memory_space<vmem>>, vector<1x256xf32>
    %4 = vector.broadcast %3 : vector<1x256xf32> to vector<8x256xf32>
    %5 = arith.addf %2, %4 : vector<8x256xf32>
    %cst_5 = arith.constant 0.000000e+00 : f32
    %6 = vector.broadcast %cst_5 : f32 to vector<8x256xf32>
    %7 = arith.maximumf %5, %6 : vector<8x256xf32>
    %c0_6 = arith.constant 0 : index
    %c0_7 = arith.constant 0 : index
    %8 = vector.load %arg4[%c0_6, %c0_7] : memref<256x256xbf16, #tpu.memory_space<vmem>>, vector<256x256xbf16>
    %cst_8 = arith.constant dense<0.000000e+00> : vector<8x256xf32>
    %9 = tpu.matmul %7, %8, %cst_8 {dimension_numbers = #tpu.dot_dimension_numbers<[1], [0], [0], [1], [0, 0, 1, 1], [], []>} : vector<8x256xf32>, vector<256x256xbf16>, vector<8x256xf32> -> vector<8x256xf32>
    %c0_9 = arith.constant 0 : index
    %c0_10 = arith.constant 0 : index
    %10 = vector.load %arg5[%c0_9, %c0_10] : memref<1x256xf32, #tpu.memory_space<vmem>>, vector<1x256xf32>
    %11 = vector.broadcast %10 : vector<1x256xf32> to vector<8x256xf32>
    %12 = arith.addf %9, %11 : vector<8x256xf32>
    %cst_11 = arith.constant 0.000000e+00 : f32
    %13 = vector.broadcast %cst_11 : f32 to vector<8x256xf32>
    %14 = arith.maximumf %12, %13 : vector<8x256xf32>
    %c0_12 = arith.constant 0 : index
    %c0_13 = arith.constant 0 : index
    %15 = vector.load %arg6[%c0_12, %c0_13] : memref<256x128xbf16, #tpu.memory_space<vmem>>, vector<256x128xbf16>
    %cst_14 = arith.constant dense<0.000000e+00> : vector<8x128xf32>
    %16 = tpu.matmul %14, %15, %cst_14 {dimension_numbers = #tpu.dot_dimension_numbers<[1], [0], [0], [1], [0, 0, 1, 1], [], []>} : vector<8x256xf32>, vector<256x128xbf16>, vector<8x128xf32> -> vector<8x128xf32>
    %c0_15 = arith.constant 0 : index
    %c0_16 = arith.constant 0 : index
    %17 = vector.load %arg7[%c0_15, %c0_16] : memref<1x128xf32, #tpu.memory_space<vmem>>, vector<1x128xf32>
    %18 = vector.broadcast %17 : vector<1x128xf32> to vector<8x128xf32>
    %19 = arith.addf %16, %18 : vector<8x128xf32>
    %cst_17 = arith.constant 0.000000e+00 : f32
    %20 = vector.broadcast %cst_17 : f32 to vector<8x128xf32>
    %21 = arith.maximumf %19, %20 : vector<8x128xf32>
    %c0_18 = arith.constant 0 : index
    %c0_19 = arith.constant 0 : index
    %22 = vector.load %arg8[%c0_18, %c0_19] : memref<128x160xbf16, #tpu.memory_space<vmem>>, vector<128x160xbf16>
    %cst_20 = arith.constant dense<0.000000e+00> : vector<8x160xf32>
    %23 = tpu.matmul %21, %22, %cst_20 {dimension_numbers = #tpu.dot_dimension_numbers<[1], [0], [0], [1], [0, 0, 1, 1], [], []>} : vector<8x128xf32>, vector<128x160xbf16>, vector<8x160xf32> -> vector<8x160xf32>
    %c0_21 = arith.constant 0 : index
    %c0_22 = arith.constant 0 : index
    %24 = vector.load %arg9[%c0_21, %c0_22] : memref<1x160xf32, #tpu.memory_space<vmem>>, vector<1x160xf32>
    %25 = vector.broadcast %24 : vector<1x160xf32> to vector<8x160xf32>
    %26 = arith.addf %23, %25 : vector<8x160xf32>
    %27 = vector.extract_strided_slice %26 {offsets = [0, 0], sizes = [8, 128], strides = [1, 1]} : vector<8x160xf32> to vector<8x128xf32>
    %28 = vector.extract_strided_slice %26 {offsets = [0, 128], sizes = [8, 32], strides = [1, 1]} : vector<8x160xf32> to vector<8x32xf32>
    %c0_23 = arith.constant 0 : index
    %c0_24 = arith.constant 0 : index
    %29 = vector.load %arg10[%c0_23, %c0_24] : memref<32x128xbf16, #tpu.memory_space<vmem>>, vector<32x128xbf16>
    %cst_25 = arith.constant dense<0.000000e+00> : vector<8x128xf32>
    %30 = tpu.matmul %28, %29, %cst_25 {dimension_numbers = #tpu.dot_dimension_numbers<[1], [0], [0], [1], [0, 0, 1, 1], [], []>} : vector<8x32xf32>, vector<32x128xbf16>, vector<8x128xf32> -> vector<8x128xf32>
    %31 = arith.addf %27, %30 : vector<8x128xf32>
    %cst_26 = arith.constant 0.000000e+00 : f32
    %32 = vector.broadcast %cst_26 : f32 to vector<8x128xf32>
    %33 = arith.maximumf %31, %32 : vector<8x128xf32>
    %c0_27 = arith.constant 0 : index
    %c0_28 = arith.constant 0 : index
    %34 = vector.load %arg11[%c0_27, %c0_28] : memref<128x5xbf16, #tpu.memory_space<vmem>>, vector<128x5xbf16>
    %cst_29 = arith.constant dense<0.000000e+00> : vector<8x5xf32>
    %35 = tpu.matmul %33, %34, %cst_29 {dimension_numbers = #tpu.dot_dimension_numbers<[1], [0], [0], [1], [0, 0, 1, 1], [], []>} : vector<8x128xf32>, vector<128x5xbf16>, vector<8x5xf32> -> vector<8x5xf32>
    %c0_30 = arith.constant 0 : index
    %c0_31 = arith.constant 0 : index
    %36 = vector.load %arg12[%c0_30, %c0_31] : memref<1x5xf32, #tpu.memory_space<vmem>>, vector<1x5xf32>
    %37 = vector.broadcast %36 : vector<1x5xf32> to vector<8x5xf32>
    %38 = arith.addf %35, %37 : vector<8x5xf32>
    %39 = vector.extract_strided_slice %38 {offsets = [0, 0], sizes = [8, 4], strides = [1, 1]} : vector<8x5xf32> to vector<8x4xf32>
    %40 = vector.extract_strided_slice %38 {offsets = [0, 4], sizes = [8, 1], strides = [1, 1]} : vector<8x5xf32> to vector<8x1xf32>
    %41 = arith.negf %40 : vector<8x1xf32>
    %42 = math.exp %41 : vector<8x1xf32>
    %cst_32 = arith.constant 1.000000e+00 : f32
    %43 = vector.broadcast %cst_32 : f32 to vector<8x1xf32>
    %44 = arith.addf %43, %42 : vector<8x1xf32>
    %45 = arith.divf %43, %44 : vector<8x1xf32>
    %cst_33 = arith.constant dense<0xFF800000> : vector<8xf32>
    %46 = vector.multi_reduction <maximumf>, %39, %cst_33 [1] : vector<8x4xf32> to vector<8xf32>
    %47 = vector.shape_cast %46 : vector<8xf32> to vector<8x1xf32>
    %48 = vector.broadcast %47 : vector<8x1xf32> to vector<8x4xf32>
    %49 = arith.subf %39, %48 : vector<8x4xf32>
    %50 = math.exp %49 : vector<8x4xf32>
    %cst_34 = arith.constant dense<0.000000e+00> : vector<8xf32>
    %51 = vector.multi_reduction <add>, %50, %cst_34 [1] : vector<8x4xf32> to vector<8xf32>
    %52 = vector.shape_cast %51 : vector<8xf32> to vector<8x1xf32>
    %53 = vector.broadcast %52 : vector<8x1xf32> to vector<8x4xf32>
    %54 = arith.divf %50, %53 : vector<8x4xf32>
    %55 = vector.extract_strided_slice %28 {offsets = [0, 0], sizes = [8, 8], strides = [1, 1]} : vector<8x32xf32> to vector<8x8xf32>
    %cst_35 = arith.constant dense<0xFF800000> : vector<8xf32>
    %56 = vector.multi_reduction <maximumf>, %55, %cst_35 [1] : vector<8x8xf32> to vector<8xf32>
    %57 = vector.shape_cast %56 : vector<8xf32> to vector<8x1xf32>
    %58 = vector.broadcast %57 : vector<8x1xf32> to vector<8x8xf32>
    %59 = arith.subf %55, %58 : vector<8x8xf32>
    %60 = vector.extract_strided_slice %28 {offsets = [0, 8], sizes = [8, 8], strides = [1, 1]} : vector<8x32xf32> to vector<8x8xf32>
    %cst_36 = arith.constant dense<0xFF800000> : vector<8xf32>
    %61 = vector.multi_reduction <maximumf>, %60, %cst_36 [1] : vector<8x8xf32> to vector<8xf32>
    %62 = vector.shape_cast %61 : vector<8xf32> to vector<8x1xf32>
    %63 = vector.broadcast %62 : vector<8x1xf32> to vector<8x8xf32>
    %64 = arith.subf %60, %63 : vector<8x8xf32>
    %65 = vector.extract_strided_slice %28 {offsets = [0, 16], sizes = [8, 8], strides = [1, 1]} : vector<8x32xf32> to vector<8x8xf32>
    %cst_37 = arith.constant dense<0xFF800000> : vector<8xf32>
    %66 = vector.multi_reduction <maximumf>, %65, %cst_37 [1] : vector<8x8xf32> to vector<8xf32>
    %67 = vector.shape_cast %66 : vector<8xf32> to vector<8x1xf32>
    %68 = vector.broadcast %67 : vector<8x1xf32> to vector<8x8xf32>
    %69 = arith.subf %65, %68 : vector<8x8xf32>
    %70 = vector.extract_strided_slice %28 {offsets = [0, 24], sizes = [8, 8], strides = [1, 1]} : vector<8x32xf32> to vector<8x8xf32>
    %cst_38 = arith.constant dense<0xFF800000> : vector<8xf32>
    %71 = vector.multi_reduction <maximumf>, %70, %cst_38 [1] : vector<8x8xf32> to vector<8xf32>
    %72 = vector.shape_cast %71 : vector<8xf32> to vector<8x1xf32>
    %73 = vector.broadcast %72 : vector<8x1xf32> to vector<8x8xf32>
    %74 = arith.subf %70, %73 : vector<8x8xf32>
    %75 = tpu.concatenate %59, %64, %69, %74 in 1 : vector<8x8xf32>, vector<8x8xf32>, vector<8x8xf32>, vector<8x8xf32> -> vector<8x32xf32>
    %76 = math.exp %75 : vector<8x32xf32>
    %c0_39 = arith.constant 0 : index
    %c0_40 = arith.constant 0 : index
    %77 = vector.load %arg13[%c0_39, %c0_40] : memref<32x4xf32, #tpu.memory_space<vmem>>, vector<32x4xf32>
    %cst_41 = arith.constant dense<0.000000e+00> : vector<8x4xf32>
    %78 = tpu.matmul %76, %77, %cst_41 {dimension_numbers = #tpu.dot_dimension_numbers<[1], [0], [0], [1], [0, 0, 1, 1], [], []>} : vector<8x32xf32>, vector<32x4xf32>, vector<8x4xf32> -> vector<8x4xf32>
    %79 = arith.mulf %76, %75 : vector<8x32xf32>
    %cst_42 = arith.constant dense<0.000000e+00> : vector<8x4xf32>
    %80 = tpu.matmul %79, %77, %cst_42 {dimension_numbers = #tpu.dot_dimension_numbers<[1], [0], [0], [1], [0, 0, 1, 1], [], []>} : vector<8x32xf32>, vector<32x4xf32>, vector<8x4xf32> -> vector<8x4xf32>
    %81 = math.log %78 : vector<8x4xf32>
    %82 = arith.divf %80, %78 : vector<8x4xf32>
    %83 = arith.subf %81, %82 : vector<8x4xf32>
    %cst_43 = arith.constant 9.99999993E-9 : f32
    %84 = vector.broadcast %cst_43 : f32 to vector<8x4xf32>
    %85 = arith.addf %54, %84 : vector<8x4xf32>
    %86 = math.log %85 : vector<8x4xf32>
    %cst_44 = arith.constant 1.000000e-01 : f32
    %87 = vector.broadcast %cst_44 : f32 to vector<8x4xf32>
    %88 = arith.mulf %87, %86 : vector<8x4xf32>
    %89 = arith.subf %83, %88 : vector<8x4xf32>
    %90 = arith.mulf %54, %89 : vector<8x4xf32>
    %cst_45 = arith.constant dense<0.000000e+00> : vector<8xf32>
    %91 = vector.multi_reduction <add>, %90, %cst_45 [1] : vector<8x4xf32> to vector<8xf32>
    %92 = vector.shape_cast %91 : vector<8xf32> to vector<8x1xf32>
    %cst_46 = arith.constant 0.000000e+00 : f32
    %93 = vector.broadcast %cst_46 : f32 to vector<8x90xf32>
    %94 = tpu.concatenate %28, %54, %92, %45, %93 in 1 : vector<8x32xf32>, vector<8x4xf32>, vector<8x1xf32>, vector<8x1xf32>, vector<8x90xf32> -> vector<8x128xf32>
    %c0_47 = arith.constant 0 : index
    %c0_48 = arith.constant 0 : index
    %95 = vector.load %arg14[%c0_47, %c0_48] : memref<8x128xf32, #tpu.memory_space<vmem>>, vector<8x128xf32>
    tpu.vector_store %arg14[%c0_47, %c0_48], %94 {strides = array<i32>} : memref<8x128xf32, #tpu.memory_space<vmem>>, vector<8x128xf32>,
    return
  }
  func.func @transform_0(%arg0: i32) -> (i32, i32) {
    %c0_i32 = arith.constant 0 : i32
    %c0_i32_0 = arith.constant 0 : i32
    return %arg0, %c0_i32 : i32, i32
  }
  func.func @transform_1(%arg0: i32) -> (i32, i32) {
    %c0_i32 = arith.constant 0 : i32
    %c0_i32_0 = arith.constant 0 : i32
    %c0_i32_1 = arith.constant 0 : i32
    return %c0_i32, %c0_i32_0 : i32, i32
  }
  func.func @transform_2(%arg0: i32) -> (i32, i32) {
    %c0_i32 = arith.constant 0 : i32
    %c0_i32_0 = arith.constant 0 : i32
    %c0_i32_1 = arith.constant 0 : i32
    return %c0_i32, %c0_i32_0 : i32, i32
  }
  func.func @transform_3(%arg0: i32) -> (i32, i32) {
    %c0_i32 = arith.constant 0 : i32
    %c0_i32_0 = arith.constant 0 : i32
    %c0_i32_1 = arith.constant 0 : i32
    return %c0_i32, %c0_i32_0 : i32, i32
  }
  func.func @transform_4(%arg0: i32) -> (i32, i32) {
    %c0_i32 = arith.constant 0 : i32
    %c0_i32_0 = arith.constant 0 : i32
    %c0_i32_1 = arith.constant 0 : i32
    return %c0_i32, %c0_i32_0 : i32, i32
  }
  func.func @transform_5(%arg0: i32) -> (i32, i32) {
    %c0_i32 = arith.constant 0 : i32
    %c0_i32_0 = arith.constant 0 : i32
    %c0_i32_1 = arith.constant 0 : i32
    return %c0_i32, %c0_i32_0 : i32, i32
  }
  func.func @transform_6(%arg0: i32) -> (i32, i32) {
    %c0_i32 = arith.constant 0 : i32
    %c0_i32_0 = arith.constant 0 : i32
    %c0_i32_1 = arith.constant 0 : i32
    return %c0_i32, %c0_i32_0 : i32, i32
  }
  func.func @transform_7(%arg0: i32) -> (i32, i32) {
    %c0_i32 = arith.constant 0 : i32
    %c0_i32_0 = arith.constant 0 : i32
    %c0_i32_1 = arith.constant 0 : i32
    return %c0_i32, %c0_i32_0 : i32, i32
  }
  func.func @transform_8(%arg0: i32) -> (i32, i32) {
    %c0_i32 = arith.constant 0 : i32
    %c0_i32_0 = arith.constant 0 : i32
    %c0_i32_1 = arith.constant 0 : i32
    return %c0_i32, %c0_i32_0 : i32, i32
  }
  func.func @transform_9(%arg0: i32) -> (i32, i32) {
    %c0_i32 = arith.constant 0 : i32
    %c0_i32_0 = arith.constant 0 : i32
    %c0_i32_1 = arith.constant 0 : i32
    return %c0_i32, %c0_i32_0 : i32, i32
  }
  func.func @transform_10(%arg0: i32) -> (i32, i32) {
    %c0_i32 = arith.constant 0 : i32
    %c0_i32_0 = arith.constant 0 : i32
    %c0_i32_1 = arith.constant 0 : i32
    return %c0_i32, %c0_i32_0 : i32, i32
  }
  func.func @transform_11(%arg0: i32) -> (i32, i32) {
    %c0_i32 = arith.constant 0 : i32
    %c0_i32_0 = arith.constant 0 : i32
    %c0_i32_1 = arith.constant 0 : i32
    return %c0_i32, %c0_i32_0 : i32, i32
  }
  func.func @transform_12(%arg0: i32) -> (i32, i32) {
    %c0_i32 = arith.constant 0 : i32
    %c0_i32_0 = arith.constant 0 : i32
    %c0_i32_1 = arith.constant 0 : i32
    return %c0_i32, %c0_i32_0 : i32, i32
  }
  func.func @transform_13(%arg0: i32) -> (i32, i32) {
    %c0_i32 = arith.constant 0 : i32
    %c0_i32_0 = arith.constant 0 : i32
    return %arg0, %c0_i32 : i32, i32
  }
}

</mosaic_0001>

<bundles_post_ra>
// kernel: tpu_custom_call.1
= control target key start
LH: loop header
LB: loop body
LE: loop exit
PB: predicated region body
PF: predicated region fallthrough
CT: control target
= control target key end

     0   :  { %18 = vsyncpa [#allocation3], 0  ;;  %s2136_s0 = inlined_call_operand.hbm [shape: f32[8,32], index: 0, kind: input, shape index: {}]   ;;  %s2137_s1 = inlined_call_operand.hbm [shape: bf16[32,256], index: 1, kind: input, shape index: {}]   ;;  %s2138_s2 = inlined_call_operand.vmem [shape: f32[1,256], index: 2, kind: input, shape index: {}]   ;;  %s2139_s3 = inlined_call_operand.vmem [shape: bf16[256,256], index: 3, kind: input, shape index: {}]   ;;  %s2140_s4 = inlined_call_operand.hbm [shape: f32[1,256], index: 4, kind: input, shape index: {}]   ;;  %s2141_s5 = inlined_call_operand.hbm [shape: bf16[256,128], index: 5, kind: input, shape index: {}]   ;;  %s2142_s6 = inlined_call_operand.hbm [shape: f32[1,128], index: 6, kind: input, shape index: {}]   ;;  %s2143_s7 = inlined_call_operand.vmem [shape: bf16[128,160], index: 7, kind: input, shape index: {}]   ;;  %s2144_s8 = inlined_call_operand.hbm [shape: f32[1,160], index: 8, kind: input, shape index: {}]   ;;  %s2145_s9 = inlined_call_operand.hbm [shape: bf16[32,128], index: 9, kind: input, shape index: {}]   ;;  %s2146_s10 = inlined_call_operand.vmem [shape: bf16[128,5], index: 10, kind: input, shape index: {}]   ;;  %s2147_s11 = inlined_call_operand.vmem [shape: f32[1,5], index: 11, kind: input, shape index: {}]   ;;  %s2148_s12 = inlined_call_operand.vmem [shape: f32[32,4], index: 12, kind: input, shape index: {}]   ;;  %s2149_s13 = inlined_call_operand.hbm [shape: f32[8,128], index: 13, kind: output, shape index: {}]  }
   0x1   :  { %19 = vsyncpa [#allocation6], 0 }
   0x2   :  { %20 = vsyncpa [#allocation9], 0 }
   0x3   :  { %21 = vsyncpa [#allocation12], 0 }
   0x4   :  { %22 = vsyncpa [#allocation4], 0  ;;  %s1702_s25 = smov [#allocation5]   ;;  %s1516_s29 = scalar_lea.hbm %s2137_s1, 512 }
   0x5   :  { %s38_s26 = sshll.u32 %s1702_s25, 4  ;;  %p1517_p0 = scmp.ne.s32.totalorder %s2137_s1, %s1516_s29  ;;  %s39_s26 = int_to_ptr.vmem [resolvable:$true] %s38_s26 }
   0x6   :  { %p1520_p1 = scmp.lt.u32.totalorder %s1516_s29, %s2137_s1 }
   0x8   :  { %p1522_p2 = pnand %p1520_p1, %p1517_p0 }
   0xa   :  { %1525 = shalt.err (!%p1522_p2)
}
   0xb   :  { %s1526_s17 = scalar_lea.vmem %s39_s26, 512  ;;  %p1531_p4 = scmp.lt.s32.totalorder %s39_s26, %s39_s26 }
   0xc   :  { %p1527_p3 = scmp.ne.s32.totalorder %s39_s26, %s1526_s17  ;;  %p1532_p5 = scmp.lt.s32.totalorder %s1526_s17, %s1526_s17 }
   0xe   :  { %p1533_p6 = por %p1532_p5, %p1531_p4 }
  0x10   :  { %p1534_p7 = pnand %p1533_p6, %p1527_p3 }
  0x12   :  { %1537 = shalt.err (!%p1534_p7)
}
  0x13   :  { %s1703_s18 = smov 128   ;;  %s1704_s19 = smov 8  }
  0x14   :  { %44 = dma.hbm_to_vmem [thread:$0]  %s2137_s1, 512, %s39_s26, [#allocation6], %s1703_s18, %s1703_s18, %s1704_s19  }
  0x15   :  { %s1705_s22 = smov [#allocation8]   ;;  %s1538_s27 = scalar_lea.hbm %s2141_s5, 2048 }
  0x16   :  { %s64_s23 = sshll.u32 %s1705_s22, 4  ;;  %p1539_p8 = scmp.ne.s32.totalorder %s2141_s5, %s1538_s27  ;;  %s65_s23 = int_to_ptr.vmem [resolvable:$true] %s64_s23 }
  0x17   :  { %p1542_p9 = scmp.lt.u32.totalorder %s1538_s27, %s2141_s5 }
  0x19   :  { %p1544_p10 = pnand %p1542_p9, %p1539_p8 }
  0x1b   :  { %1547 = shalt.err (!%p1544_p10)
}
  0x1c   :  { %s1548_s15 = scalar_lea.vmem %s65_s23, 2048  ;;  %p1553_p12 = scmp.lt.s32.totalorder %s65_s23, %s65_s23 }
  0x1d   :  { %p1549_p11 = scmp.ne.s32.totalorder %s65_s23, %s1548_s15  ;;  %p1554_p13 = scmp.lt.s32.totalorder %s1548_s15, %s1548_s15 }
  0x1f   :  { %p1555_p0 = por %p1554_p13, %p1553_p12 }
  0x21   :  { %p1556_p1 = pnand %p1555_p0, %p1549_p11 }
  0x23   :  { %1559 = shalt.err (!%p1556_p1)
}
  0x24   :  { %s1706_s1 = smov 64   ;;  %s1707_s26 = smov 4  }
  0x25   :  { %70 = dma.hbm_to_vmem [thread:$0]  %s2141_s5, 2048, %s65_s23, [#allocation9], %s1706_s1, %s1706_s1, %s1707_s26  }
  0x26   :  { %s1708_s18 = smov [#allocation11]   ;;  %s1709_s20 = smov [#allocation2]  }
  0x27   :  { %s89_s19 = sshll.u32 %s1708_s18, 4  ;;  %s29_s21 = sshll.u32 %s1709_s20, 4  ;;  %s90_s19 = int_to_ptr.vmem [resolvable:$true] %s89_s19  ;;  %s30_s21 = int_to_ptr.vmem [resolvable:$true] %s29_s21 }
  0x28   :  { %s1560_s25 = scalar_lea.hbm %s2144_s8, 32 }
  0x29   :  { %p1561_p2 = scmp.ne.s32.totalorder %s2144_s8, %s1560_s25  ;;  %p1564_p3 = scmp.lt.u32.totalorder %s1560_s25, %s2144_s8 }
  0x2b   :  { %p1566_p4 = pnand %p1564_p3, %p1561_p2 }
  0x2d   :  { %1569 = shalt.err (!%p1566_p4)
}
  0x2e   :  { %s1570_s5 = scalar_lea.vmem %s90_s19, 32  ;;  %p1575_p6 = scmp.lt.s32.totalorder %s90_s19, %s90_s19 }
  0x2f   :  { %p1571_p5 = scmp.ne.s32.totalorder %s90_s19, %s1570_s5  ;;  %p1576_p7 = scmp.lt.s32.totalorder %s1570_s5, %s1570_s5 }
  0x31   :  { %p1577_p8 = por %p1576_p7, %p1575_p6 }
  0x33   :  { %p1578_p9 = pnand %p1577_p8, %p1571_p5 }
  0x35   :  { %1581 = shalt.err (!%p1578_p9)
}
  0x36   :  { %92 = dma.hbm_to_vmem [thread:$0]  %s2144_s8, 32, %s90_s19, [#allocation12]  }
  0x37   :  { %s1582_s17 = scalar_lea.hbm %s2136_s0, 128 }
  0x38   :  { %p1583_p10 = scmp.ne.s32.totalorder %s2136_s0, %s1582_s17  ;;  %p1586_p11 = scmp.lt.u32.totalorder %s1582_s17, %s2136_s0 }
  0x3a   :  { %p1588_p12 = pnand %p1586_p11, %p1583_p10 }
  0x3c   :  { %1591 = shalt.err (!%p1588_p12)
}
  0x3d   :  { %s1592_s25 = scalar_lea.vmem %s30_s21, 128  ;;  %p1597_p0 = scmp.lt.s32.totalorder %s30_s21, %s30_s21 }
  0x3e   :  { %p1593_p13 = scmp.ne.s32.totalorder %s30_s21, %s1592_s25  ;;  %p1598_p1 = scmp.lt.s32.totalorder %s1592_s25, %s1592_s25 }
  0x40   :  { %p1599_p2 = por %p1598_p1, %p1597_p0 }
  0x42   :  { %p1600_p3 = pnand %p1599_p2, %p1593_p13 }
  0x44   :  { %1603 = shalt.err (!%p1600_p3)
}
  0x45   :  { %32 = dma.hbm_to_vmem [thread:$0]  %s2136_s0, 128, %s30_s21, [#allocation3]  }
  0x46   :  { %s1710_s27 = smov [#allocation7]   ;;  %s1711_s29 = smov [#allocation10]  }
  0x47   :  { %s55_s28 = sshll.u32 %s1710_s27, 4  ;;  %s77_s30 = sshll.u32 %s1711_s29, 4  ;;  %s56_s28 = int_to_ptr.vmem [resolvable:$true] %s55_s28  ;;  %s78_s30 = int_to_ptr.vmem [resolvable:$true] %s77_s30 }
  0x48   :  { %s1604_s14 = scalar_lea.hbm %s2140_s4, 32 }
  0x49   :  { %p1605_p4 = scmp.ne.s32.totalorder %s2140_s4, %s1604_s14  ;;  %p1608_p5 = scmp.lt.u32.totalorder %s1604_s14, %s2140_s4 }
  0x4b   :  { %p1610_p6 = pnand %p1608_p5, %p1605_p4 }
  0x4d   :  { %1613 = shalt.err (!%p1610_p6)
}
  0x4e   :  { %s1614_s0 = scalar_lea.vmem %s56_s28, 32  ;;  %p1619_p8 = scmp.lt.s32.totalorder %s56_s28, %s56_s28 }
  0x4f   :  { %p1615_p7 = scmp.ne.s32.totalorder %s56_s28, %s1614_s0  ;;  %p1620_p9 = scmp.lt.s32.totalorder %s1614_s0, %s1614_s0 }
  0x51   :  { %p1621_p10 = por %p1620_p9, %p1619_p8 }
  0x53   :  { %p1622_p11 = pnand %p1621_p10, %p1615_p7 }
  0x55   :  { %1625 = shalt.err (!%p1622_p11)
}
  0x56   :  { %58 = dma.hbm_to_vmem [thread:$0]  %s2140_s4, 32, %s56_s28, [#allocation6]  }
  0x57   :  { %s1626_s25 = scalar_lea.hbm %s2142_s6, 16 }
  0x58   :  { %p1627_p12 = scmp.ne.s32.totalorder %s2142_s6, %s1626_s25  ;;  %p1630_p13 = scmp.lt.u32.totalorder %s1626_s25, %s2142_s6 }
  0x5a   :  { %p1632_p0 = pnand %p1630_p13, %p1627_p12 }
  0x5c   :  { %1635 = shalt.err (!%p1632_p0)
}
  0x5d   :  { %s1636_s5 = scalar_lea.vmem %s78_s30, 16  ;;  %s1640_s23 = scalar_lea.vmem %s78_s30, 32 }
  0x5e   :  { %p1637_p1 = scmp.ne.s32.totalorder %s78_s30, %s1636_s5  ;;  %p1641_p2 = scmp.lt.s32.totalorder %s78_s30, %s78_s30 }
  0x5f   :  { %p1642_p3 = scmp.lt.s32.totalorder %s1640_s23, %s1636_s5 }
  0x61   :  { %p1643_p4 = por %p1642_p3, %p1641_p2 }
  0x63   :  { %p1644_p5 = pnand %p1643_p4, %p1637_p1 }
  0x65   :  { %1647 = shalt.err (!%p1644_p5)
}
  0x66   :  { %80 = dma.hbm_to_vmem [thread:$0]  %s2142_s6, 16, %s78_s30, [#allocation9]  }
  0x67   :  { %s1712_s14 = smov [#allocation13]   ;;  %s1648_s18 = scalar_lea.hbm %s2145_s9, 256 }
  0x68   :  { %s98_s15 = sshll.u32 %s1712_s14, 4  ;;  %p1649_p6 = scmp.ne.s32.totalorder %s2145_s9, %s1648_s18  ;;  %s99_s15 = int_to_ptr.vmem [resolvable:$true] %s98_s15 }
  0x69   :  { %p1652_p7 = scmp.lt.u32.totalorder %s1648_s18, %s2145_s9 }
  0x6b   :  { %p1654_p8 = pnand %p1652_p7, %p1649_p6 }
  0x6d   :  { %1657 = shalt.err (!%p1654_p8)
}
  0x6e   :  { %s1658_s24 = scalar_lea.vmem %s99_s15, 256  ;;  %p1663_p10 = scmp.lt.s32.totalorder %s99_s15, %s99_s15 }
  0x6f   :  { %p1659_p9 = scmp.ne.s32.totalorder %s99_s15, %s1658_s24  ;;  %p1664_p11 = scmp.lt.s32.totalorder %s1658_s24, %s1658_s24 }
  0x71   :  { %p1665_p12 = por %p1664_p11, %p1663_p10 }
  0x73   :  { %p1666_p13 = pnand %p1665_p12, %p1659_p9 }
  0x75   :  { %1669 = shalt.err (!%p1666_p13)
}
  0x76   :  { %104 = dma.hbm_to_vmem [thread:$0]  %s2145_s9, 256, %s99_s15, [#allocation12], %s1706_s1, %s1706_s1, %s1707_s26  }
  0x77   :  { %1692 = dma.done.wait [#allocation3], 128  }
  0x78   :  { %1693 = vsyncadd [#allocation3], 4294967168 }
  0x79   :  { %1694 = dma.done.wait [#allocation6], 544  }
  0x7a   :  { %1695 = vsyncadd [#allocation6], 4294966752 }
  0x7b   :  { %1696 = dma.done.wait [#allocation9], 2064  }
  0x7c   :  { %1697 = vsyncadd [#allocation9], 4294965232 }
  0x7d   :  { %1698 = dma.done.wait [#allocation12], 288  }
  0x7e   :  { %1699 = vsyncadd [#allocation12], 4294967008  ;;  %v1713_v0 = vmov 0.0   ;;  %v1396_v1 = vld [vmem:[#allocation5 + $0x4] ss:$8 sps:$4 sm:$0xff]   ;;  %v133_v6 = vld [vmem:[#allocation2] sm:$0xff]  ;;  %v140_v51 = vlaneseq }
  0x7f   :  { %206 = vmatprep.mubr.f32.mxu1 %v1713_v0  ;;  %v1398_v2 = vld [vmem:[#allocation5] ss:$8 sps:$4 sm:$0xff]   ;;  %174 = vmatprep.subr.bf16.mxu1 %v1396_v1  ;;  %v1399_v3 = vld [vmem:[#allocation5 + $0x14] ss:$8 sps:$4 sm:$0xff]   ;;  %v1401_v4 = vld [vmem:[#allocation5 + $0x10] ss:$8 sps:$4 sm:$0xff]  }
  0x80   :  { %175 = vmatpush1.bf16.msra.mxu1 %v1398_v2  ;;  %v1404_v5 = vld [vmem:[%s2139_s3 + $0x4] ss:$8 sps:$4 sm:$0xff]   ;;  %vm170_vm0 = vcmask 261120   ;;  %v1402_v7 = vld [vmem:[%s2139_s3] ss:$8 sps:$4 sm:$0xff]   ;;  %v1452_v40 = vld [vmem:[#allocation8 + $0x48] sm:$0xff]  }
  0x81   :  { %176 = vmatprep.subr.bf16.mxu1 %v1399_v3  ;;  %v1407_v8 = vld [vmem:[%s2139_s3 + $0x14] ss:$8 sps:$4 sm:$0xff]   ;;  %v1405_v9 = vld [vmem:[%s2139_s3 + $0x10] ss:$8 sps:$4 sm:$0xff]   ;;  %v1410_v10 = vld [vmem:[%s2139_s3 + $0x24] ss:$8 sps:$4 sm:$0xff]  }
  0x82   :  { %v1408_v11 = vld [vmem:[%s2139_s3 + $0x20] ss:$8 sps:$4 sm:$0xff]   ;;  %v1413_v12 = vld [vmem:[%s2139_s3 + $0x34] ss:$8 sps:$4 sm:$0xff]   ;;  %v1411_v13 = vld [vmem:[%s2139_s3 + $0x30] ss:$8 sps:$4 sm:$0xff]  }
  0x83   :  { %v1416_v14 = vld [vmem:[%s2139_s3 + $0x44] ss:$8 sps:$4 sm:$0xff]   ;;  %v1414_v15 = vld [vmem:[%s2139_s3 + $0x40] ss:$8 sps:$4 sm:$0xff]   ;;  %v1419_v16 = vld [vmem:[%s2139_s3 + $0x54] ss:$8 sps:$4 sm:$0xff]  }
  0x84   :  { %177 = vmatpush1.bf16.msra.mxu1 %v1401_v4  ;;  %v1417_v17 = vld [vmem:[%s2139_s3 + $0x50] ss:$8 sps:$4 sm:$0xff]   ;;  %v1422_v18 = vld [vmem:[%s2139_s3 + $0x64] ss:$8 sps:$4 sm:$0xff]   ;;  %v1420_v19 = vld [vmem:[%s2139_s3 + $0x60] ss:$8 sps:$4 sm:$0xff]  }
  0x85   :  { %419 = vmatprep.subr.bf16.mxu1 %v1404_v5  ;;  %v1425_v20 = vld [vmem:[%s2139_s3 + $0x74] ss:$8 sps:$4 sm:$0xff]   ;;  %v1423_v21 = vld [vmem:[%s2139_s3 + $0x70] ss:$8 sps:$4 sm:$0xff]   ;;  %v1428_v22 = vld [vmem:[%s2139_s3 + $0x84] ss:$8 sps:$4 sm:$0xff]  }
  0x86   :  { %v1426_v23 = vld [vmem:[%s2139_s3 + $0x80] ss:$8 sps:$4 sm:$0xff]   ;;  %v1431_v24 = vld [vmem:[%s2139_s3 + $0x94] ss:$8 sps:$4 sm:$0xff]   ;;  %v1429_v25 = vld [vmem:[%s2139_s3 + $0x90] ss:$8 sps:$4 sm:$0xff]  }
  0x87   :  { %1197 = vmatmul.mubr.msk.f32.vlgmr.msra.gmra.mrb[0].mxu1 %vm170_vm0, %v133_v6  ;;  %v1434_v26 = vld [vmem:[%s2139_s3 + $0xa4] ss:$8 sps:$4 sm:$0xff]   ;;  %v1432_v27 = vld [vmem:[%s2139_s3 + $0xa0] ss:$8 sps:$4 sm:$0xff]   ;;  %v1437_v28 = vld [vmem:[%s2139_s3 + $0xb4] ss:$8 sps:$4 sm:$0xff]  }
  0x88   :  { %420 = vmatpush1.bf16.msra.mxu1 %v1402_v7  ;;  %v1435_v29 = vld [vmem:[%s2139_s3 + $0xb0] ss:$8 sps:$4 sm:$0xff]   ;;  %v1440_v30 = vld [vmem:[%s2139_s3 + $0xc4] ss:$8 sps:$4 sm:$0xff]   ;;  %v1438_v31 = vld [vmem:[%s2139_s3 + $0xc0] ss:$8 sps:$4 sm:$0xff]  }
  0x89   :  { %421 = vmatprep.subr.bf16.mxu1 %v1407_v8  ;;  %v1443_v32 = vld [vmem:[%s2139_s3 + $0xd4] ss:$8 sps:$4 sm:$0xff]   ;;  %v1441_v33 = vld [vmem:[%s2139_s3 + $0xd0] ss:$8 sps:$4 sm:$0xff]   ;;  %v1446_v34 = vld [vmem:[%s2139_s3 + $0xe4] ss:$8 sps:$4 sm:$0xff]  }
  0x8a   :  { %v1444_v35 = vld [vmem:[%s2139_s3 + $0xe0] ss:$8 sps:$4 sm:$0xff]   ;;  %v1449_v36 = vld [vmem:[%s2139_s3 + $0xf4] ss:$8 sps:$4 sm:$0xff]   ;;  %v1447_v37 = vld [vmem:[%s2139_s3 + $0xf0] ss:$8 sps:$4 sm:$0xff]  }
  0x8b   :  { %v1450_v38 = vld [vmem:[#allocation8 + $0x40] sm:$0xff]   ;;  %v1453_v41 = vld [vmem:[#allocation8 + $0x8] sm:$0xff]   ;;  %v1454_v42 = vld [vmem:[#allocation8 + $0x50] sm:$0xff]   ;;  %v141_v52 = vshrl.u32 %v140_v51, 7  ;;  %vm1714_vm1 = vmmov 0   ;;  %vm977_vm2 = vcmask 195712  }
  0x8c   :  { %422 = vmatpush1.bf16.msra.mxu1 %v1405_v9  ;;  %v1451_v39 = vld [vmem:[#allocation8] sm:$0xff]   ;;  %1278 = vmatprep.subr.bf16.mxu0 %v1450_v38  ;;  %v1455_v43 = vld [vmem:[#allocation8 + $0x10] sm:$0xff]   ;;  %v1456_v44 = vld [vmem:[#allocation8 + $0x58] sm:$0xff]   ;;  %vm967_vm3 = vcmask 64512   ;;  %vm982_vm4 = vcmask 261312   ;;  %vm972_vm5 = vcmask 130112  }
  0x8d   :  { %423 = vmatprep.subr.bf16.mxu1 %v1410_v10  ;;  %1279 = vmatpush3.bf16.msra.mxu0 %v1451_v39  ;;  %v1457_v45 = vld [vmem:[#allocation8 + $0x18] sm:$0xff]   ;;  %v1458_v46 = vld [vmem:[#allocation8 + $0x60] sm:$0xff]   ;;  %v1460_v48 = vld [vmem:[#allocation8 + $0x68] sm:$0xff]   ;;  %v1978_v53 = vsub.s32 0, %v141_v52  ;;  %v1983_v55 = vsub.s32 1, %v141_v52  ;;  %vm988_vm6 = vcmask 130048  }
  0x8e   :  { %1280 = vmatprep.subr.bf16.mxu0 %v1452_v40  ;;  %v1459_v47 = vld [vmem:[#allocation8 + $0x20] sm:$0xff]   ;;  %v1461_v49 = vld [vmem:[#allocation8 + $0x28] sm:$0xff]   ;;  %v1462_v50 = vld [vmem:[#allocation8 + $0x70] sm:$0xff]   ;;  %vm990_vm7 = vcmask 195584   ;;  %vm955_vm8 = vcmask 31744   ;;  %s1717_s20 = smov 33  }
  0x8f   :  { %v138_v54 = vld [vmem:[%s2138_s2] sm:$0x3]  ;;  %v1464_v2 = vld [vmem:[#allocation8 + $0x78] sm:$0xff]   ;;  %v997_v51 = vld [vmem:[%s2148_s12 + $0x18] sm:$0xff]  ;;  %vm1168_vm9 = vcmask 293888   ;;  %vm1170_vm10 = vcmask 302080  }
  0x90   :  { %424 = vmatpush1.bf16.msra.mxu1 %v1408_v11  ;;  %v143_v56 = vrot.slane %v138_v54, %v1978_v53  ;;  %v147_v57 = vrot.slane %v138_v54, %v1983_v55  ;;  %v1463_v1 = vld [vmem:[#allocation8 + $0x30] sm:$0xff]   ;;  %v1465_v3 = vld [vmem:[#allocation8 + $0x38] sm:$0xff]   ;;  %s1718_s22 = smov [#allocation14]   ;;  %vm1172_vm11 = vcmask 310272  }
  0x91   :  { %425 = vmatprep.subr.bf16.mxu1 %v1413_v12  ;;  %1281 = vmatpush3.bf16.msra.mxu0 %v1453_v41  ;;  %v1468_v4 = vld [vmem:[%s2143_s7 + $0x4] ss:$8 sps:$4 sm:$0xff]   ;;  %v247_v5 = vld [vmem:[#allocation7] sm:$0x3]  ;;  %s1181_s24 = sshll.u32 %s1718_s22, 4  ;;  %s1182_s24 = int_to_ptr.vmem [resolvable:$true] %s1181_s24 }
  0x92   :  { %1282 = vmatprep.subr.bf16.mxu0 %v1454_v42  ;;  %v252_v6 = vrot.slane %v247_v5, %v1978_v53  ;;  %v256_v7 = vrot.slane %v247_v5, %v1983_v55  ;;  %v1492_v54 = vld [vmem:[%s2146_s10] sm:$0xff]   ;;  %p1675_p1 = scmp.lt.s32.totalorder %s1182_s24, %s1182_s24 }
  0x94   :  { %426 = vmatpush1.bf16.msra.mxu1 %v1411_v13  ;;  %v1466_v13 = vld [vmem:[%s2143_s7] ss:$8 sps:$4 sm:$0xff]  }
  0x95   :  { %427 = vmatprep.subr.bf16.mxu1 %v1416_v14  ;;  %1283 = vmatpush3.bf16.msra.mxu0 %v1455_v43 }
  0x96   :  { %1284 = vmatprep.subr.bf16.mxu0 %v1456_v44 }
  0x98   :  { %428 = vmatpush1.bf16.msra.mxu1 %v1414_v15  ;;  %v1471_v15 = vld [vmem:[%s2143_s7 + $0x14] ss:$8 sps:$4 sm:$0xff]  }
  0x99   :  { %429 = vmatprep.subr.bf16.mxu1 %v1419_v16  ;;  %1285 = vmatpush3.bf16.msra.mxu0 %v1457_v45  ;;  %v1469_v16 = vld [vmem:[%s2143_s7 + $0x10] ss:$8 sps:$4 sm:$0xff]  }
  0x9a   :  { %1286 = vmatprep.subr.bf16.mxu0 %v1458_v46  ;;  %v994_v46 = vld [vmem:[%s2148_s12] sm:$0xff] }
  0x9c   :  { %430 = vmatpush1.bf16.msra.mxu1 %v1417_v17  ;;  %v1474_v17 = vld [vmem:[%s2143_s7 + $0x24] ss:$8 sps:$4 sm:$0xff]  }
  0x9d   :  { %431 = vmatprep.subr.bf16.mxu1 %v1422_v18  ;;  %1287 = vmatpush3.bf16.msra.mxu0 %v1459_v47  ;;  %v1472_v18 = vld [vmem:[%s2143_s7 + $0x20] ss:$8 sps:$4 sm:$0xff]  }
  0x9e   :  { %1288 = vmatprep.subr.bf16.mxu0 %v1460_v48  ;;  %v995_v47 = vld [vmem:[%s2148_s12 + $0x8] sm:$0xff] }
  0x9f   :  { %v1368_v48 = vpack.c.bf16 %v995_v47, %v994_v46 }
  0xa0   :  { %432 = vmatpush1.bf16.msra.mxu1 %v1420_v19  ;;  %v1477_v19 = vld [vmem:[%s2143_s7 + $0x34] ss:$8 sps:$4 sm:$0xff]  }
  0xa1   :  { %433 = vmatprep.subr.bf16.mxu1 %v1425_v20  ;;  %1289 = vmatpush3.bf16.msra.mxu0 %v1461_v49  ;;  %v1475_v20 = vld [vmem:[%s2143_s7 + $0x30] ss:$8 sps:$4 sm:$0xff]   ;;  %v1715_v49 = vmov 0.0|0.0  }
  0xa2   :  { %1290 = vmatprep.subr.bf16.mxu0 %v1462_v50  ;;  %v996_v50 = vld [vmem:[%s2148_s12 + $0x10] sm:$0xff] }
  0xa3   :  { %v1371_v52 = vpack.c.bf16 %v997_v51, %v996_v50 }
  0xa4   :  { %434 = vmatpush1.bf16.msra.mxu1 %v1423_v21  ;;  %v1480_v21 = vld [vmem:[%s2143_s7 + $0x44] ss:$8 sps:$4 sm:$0xff]  }
  0xa5   :  { %435 = vmatprep.subr.bf16.mxu1 %v1428_v22  ;;  %1291 = vmatpush3.bf16.msra.mxu0 %v1463_v1  ;;  %v1478_v22 = vld [vmem:[%s2143_s7 + $0x40] ss:$8 sps:$4 sm:$0xff]  }
  0xa6   :  { %1292 = vmatprep.subr.bf16.mxu0 %v1464_v2 }
  0xa8   :  { %436 = vmatpush1.bf16.msra.mxu1 %v1426_v23  ;;  %v1483_v23 = vld [vmem:[%s2143_s7 + $0x54] ss:$8 sps:$4 sm:$0xff]  }
  0xa9   :  { %437 = vmatprep.subr.bf16.mxu1 %v1431_v24  ;;  %1293 = vmatpush3.bf16.msra.mxu0 %v1465_v3  ;;  %v1481_v24 = vld [vmem:[%s2143_s7 + $0x50] ss:$8 sps:$4 sm:$0xff]  }
  0xaa   :  { %742 = vmatprep.subr.bf16.mxu0 %v1468_v4 }
  0xac   :  { %438 = vmatpush1.bf16.msra.mxu1 %v1429_v25  ;;  %v1486_v25 = vld [vmem:[%s2143_s7 + $0x64] ss:$8 sps:$4 sm:$0xff]  }
  0xad   :  { %439 = vmatprep.subr.bf16.mxu1 %v1434_v26  ;;  %v1484_v26 = vld [vmem:[%s2143_s7 + $0x60] ss:$8 sps:$4 sm:$0xff]  }
  0xb0   :  { %440 = vmatpush1.bf16.msra.mxu1 %v1432_v27  ;;  %v1489_v27 = vld [vmem:[%s2143_s7 + $0x74] ss:$8 sps:$4 sm:$0xff]  }
  0xb1   :  { %441 = vmatprep.subr.bf16.mxu1 %v1437_v28  ;;  %v1487_v28 = vld [vmem:[%s2143_s7 + $0x70] ss:$8 sps:$4 sm:$0xff]   ;;  %s1670_s7 = scalar_lea.vmem %s1182_s24, 128 }
  0xb2   :  { %p1671_p0 = scmp.ne.s32.totalorder %s1182_s24, %s1670_s7  ;;  %p1676_p2 = scmp.lt.s32.totalorder %s1670_s7, %s1670_s7 }
  0xb4   :  { %442 = vmatpush1.bf16.msra.mxu1 %v1435_v29  ;;  %v1490_v29 = vld [vmem:[#allocation13] sm:$0xff]   ;;  %p1677_p3 = por %p1676_p2, %p1675_p1 }
  0xb5   :  { %443 = vmatprep.subr.bf16.mxu1 %v1440_v30 }
  0xb6   :  { %p1678_p4 = pnand %p1677_p3, %p1671_p0 }
  0xb8   :  { %444 = vmatpush1.bf16.msra.mxu1 %v1438_v31  ;;  %v1230_v31 = vld [vmem:[#allocation10] ss:$0 sm:$0xff] }
  0xb9   :  { %445 = vmatprep.subr.bf16.mxu1 %v1443_v32 }
  0xbc   :  { %446 = vmatpush1.bf16.msra.mxu1 %v1441_v33 }
  0xbd   :  { %447 = vmatprep.subr.bf16.mxu1 %v1446_v34 }
  0xc0   :  { %448 = vmatpush1.bf16.msra.mxu1 %v1444_v35 }
  0xc1   :  { %449 = vmatprep.subr.bf16.mxu1 %v1449_v36  ;;  %v1491_v36 = vld [vmem:[#allocation13 + $0x8] sm:$0xff]  }
  0xc4   :  { %450 = vmatpush1.bf16.msra.mxu1 %v1447_v37  ;;  %v2044_v37 = vld [vmem:[#allocation11] sm:$0x3] }
  0xc5   :  { %1319 = vmatprep.subr.bf16.mxu1 %v1713_v0  ;;  %v659_v38 = vrot.slane %v2044_v37, %v1983_v55  ;;  %v1493_v55 = vld [vmem:[%s2146_s10 + $0x8] sm:$0xff]  }
 0x15a   :  { %v208_v58 = vpop.f32.mrb[0].mxu1 }
 0x15b   :  { %v209_v59 = vadd.f32 %v208_v58, %v143_v56  ;;  %v210_v60 = vpop.f32.mrb[1].mxu1  ;;  %v1494_v56 = vld [vmem:[%s2146_s10 + $0x10] sm:$0xff]   ;;  %v1496_v58 = vld [vmem:[%s2146_s10 + $0x20] sm:$0xff]  }
 0x15c   :  { %v211_v61 = vadd.f32 %v210_v60, %v147_v57  ;;  %v1495_v57 = vld [vmem:[%s2146_s10 + $0x18] sm:$0xff]   ;;  %v1498_v60 = vld [vmem:[%s2146_s10 + $0x30] sm:$0xff]  }
 0x15d   :  { %v213_v63 = vmax.f32 %v209_v59, 0.0  ;;  %v1497_v59 = vld [vmem:[%s2146_s10 + $0x28] sm:$0xff]  }
 0x15e   :  { %v214_v62 = vmax.f32 %v211_v61, 0.0  ;;  %v1499_v61 = vld [vmem:[%s2146_s10 + $0x38] sm:$0xff]  }
 0x160   :  { %451 = vmatprep.mubr.f32.mxu1 %v214_v62 }
 0x161   :  { %452 = vmatmul.mubr.f32.vlgmr.msra.gmra.mrb[2].mxu1 %v213_v63 }
 0x162   :  { %1320 = vmatpush3.bf16.msra.mxu1 %v1490_v29  ;;  %1323 = vmatprep.mubr.msk.f32.mxu1 %vm1714_vm1, %v1713_v0 }
 0x163   :  { %1321 = vmatprep.subr.bf16.mxu1 %v1713_v0 }
 0x166   :  { %1322 = vmatpush3.bf16.msra.mxu1 %v1491_v36 }
 0x167   :  { %1367 = vmatprep.subr.bf16.mxu1 %v1715_v49 }
 0x234   :  { %v453_v8 = vpop.f32.mrb[2].mxu1 }
 0x235   :  { %v454_v9 = vadd.f32 %v453_v8, %v252_v6  ;;  %v455_v10 = vpop.f32.mrb[3].mxu1 }
 0x236   :  { %v456_v11 = vadd.f32 %v455_v10, %v256_v7 }
 0x237   :  { %v458_v14 = vmax.f32 %v454_v9, 0.0 }
 0x238   :  { %v459_v12 = vmax.f32 %v456_v11, 0.0 }
 0x23a   :  { %627 = vmatprep.mubr.f32.mxu0 %v459_v12 }
 0x23b   :  { %628 = vmatmul.mubr.f32.vlgmr.msra.gmra.mrb[0].mxu0 %v458_v14 }
 0x23c   :  { %743 = vmatpush1.bf16.msra.mxu0 %v1466_v13  ;;  %774 = vmatprep.mubr.f32.mxu0 %v1713_v0  ;;  %v655_v13 = vrot.slane %v2044_v37, %v1978_v53  ;;  %v1266_v53 = vld [vmem:[%s2147_s11] ss:$0 sm:$0xff]  ;;  %s1716_s11 = smov 32  }
 0x23d   :  { %744 = vmatprep.subr.bf16.mxu0 %v1471_v15 }
 0x240   :  { %745 = vmatpush1.bf16.msra.mxu0 %v1469_v16 }
 0x241   :  { %746 = vmatprep.subr.bf16.mxu0 %v1474_v17 }
 0x244   :  { %747 = vmatpush1.bf16.msra.mxu0 %v1472_v18 }
 0x245   :  { %748 = vmatprep.subr.bf16.mxu0 %v1477_v19 }
 0x248   :  { %749 = vmatpush1.bf16.msra.mxu0 %v1475_v20 }
 0x249   :  { %750 = vmatprep.subr.bf16.mxu0 %v1480_v21 }
 0x24c   :  { %751 = vmatpush1.bf16.msra.mxu0 %v1478_v22 }
 0x24d   :  { %752 = vmatprep.subr.bf16.mxu0 %v1483_v23 }
 0x250   :  { %753 = vmatpush1.bf16.msra.mxu0 %v1481_v24 }
 0x251   :  { %754 = vmatprep.subr.bf16.mxu0 %v1486_v25 }
 0x254   :  { %755 = vmatpush1.bf16.msra.mxu0 %v1484_v26 }
 0x255   :  { %756 = vmatprep.subr.bf16.mxu0 %v1489_v27 }
 0x258   :  { %757 = vmatpush1.bf16.msra.mxu0 %v1487_v28 }
 0x259   :  { %1326 = vmatprep.subr.bf16.mxu0 %v1713_v0 }
 0x30e   :  { %v1294_v30 = vpop.f32.mrb[0].mxu0 }
 0x30f   :  { %v1295_v32 = vpop.f32.mrb[1].mxu0 }
 0x310   :  { %v1296_v33 = vadd.f32 %v1295_v32, %v1294_v30 }
 0x312   :  { %v630_v34 = vadd.f32 %v1296_v33, %v1230_v31 }
 0x314   :  { %v633_v35 = vmax.f32 %v630_v34, 0.0 }
 0x316   :  { %775 = vmatmul.mubr.f32.vlgmr.msra.gmra.mrb[2].mxu0 %v633_v35 }
 0x317   :  { %1342 = vmatprep.mubr.msk.f32.mxu0 %vm1714_vm1, %v1713_v0  ;;  %1327 = vmatpush3.bf16.msra.mxu0 %v1492_v54 }
 0x318   :  { %1328 = vmatprep.subr.bf16.mxu0 %v1713_v0 }
 0x31b   :  { %1329 = vmatpush3.bf16.msra.mxu0 %v1493_v55 }
 0x31c   :  { %1330 = vmatprep.subr.bf16.mxu0 %v1713_v0 }
 0x31f   :  { %1331 = vmatpush3.bf16.msra.mxu0 %v1494_v56 }
 0x320   :  { %1332 = vmatprep.subr.bf16.mxu0 %v1713_v0 }
 0x323   :  { %1333 = vmatpush3.bf16.msra.mxu0 %v1495_v57 }
 0x324   :  { %1334 = vmatprep.subr.bf16.mxu0 %v1713_v0 }
 0x327   :  { %1335 = vmatpush3.bf16.msra.mxu0 %v1496_v58 }
 0x328   :  { %1336 = vmatprep.subr.bf16.mxu0 %v1713_v0 }
 0x32b   :  { %1337 = vmatpush3.bf16.msra.mxu0 %v1497_v59 }
 0x32c   :  { %1338 = vmatprep.subr.bf16.mxu0 %v1713_v0 }
 0x32f   :  { %1339 = vmatpush3.bf16.msra.mxu0 %v1498_v60 }
 0x330   :  { %1340 = vmatprep.subr.bf16.mxu0 %v1713_v0 }
 0x333   :  { %1341 = vmatpush3.bf16.msra.mxu0 %v1499_v61 }
 0x3e9   :  { %v2048_v39 = vpop.f32.mrb[2].mxu0 }
 0x3ea   :  { %v778_v40 = vpop.f32.mrb[3].mxu0  ;;  %v777_v14 = vadd.f32 %v2048_v39, %v655_v13 }
 0x3eb   :  { %v2050_v41 = vadd.f32 %v778_v40, %v659_v38 }
 0x3ed   :  { %1324 = vmatmul.mubr.msk.f32.vlgmr.msra.gmra.mrb[4].mxu1 %vm170_vm0, %v2050_v41  ;;  %v978_v42 = vsel %vm977_vm2, %v2050_v41, -inf  ;;  %v968_v43 = vsel %vm967_vm3, %v2050_v41, -inf  ;;  %v983_v44 = vsel %vm982_vm4, %v2050_v41, -inf  ;;  %v973_v45 = vsel %vm972_vm5, %v2050_v41, -inf }
 0x3ee   :  { %979 = vmax.xlane.f32.xlu1 %v978_v42  ;;  %969 = vmax.xlane.f32.xlu0 %v968_v43 }
 0x3ef   :  { %1353 = vmatprep.mubr.msk.f32.mxu1 %vm1714_vm1, %v1713_v0  ;;  %1369 = vmatpush3.bf16.msra.mxu1 %v1368_v48 }
 0x3f0   :  { %1370 = vmatprep.subr.bf16.mxu1 %v1715_v49 }
 0x3f2   :  { %984 = vmax.xlane.f32.xlu1 %v983_v44  ;;  %974 = vmax.xlane.f32.xlu0 %v973_v45 }
 0x3f3   :  { %1372 = vmatpush3.bf16.msra.mxu1 %v1371_v52 }
 0x3f4   :  { %1373 = vmatprep.subr.bf16.mxu1 %v1715_v49 }
 0x47b   :  { %v980_v62 = vpop.xlane.xlu1 %979  ;;  %v970_v63 = vpop.xlane.xlu0 %969 }
 0x47c   :  { %v971_v3 = vsub.f32 %v2050_v41, %v970_v63  ;;  %v981_v5 = vsub.f32 %v2050_v41, %v980_v62 }
 0x47f   :  { %v985_v1 = vpop.xlane.xlu1 %984  ;;  %v975_v2 = vpop.xlane.xlu0 %974 }
 0x480   :  { %v976_v4 = vsub.f32 %v2050_v41, %v975_v2  ;;  %v986_v6 = vsub.f32 %v2050_v41, %v985_v1 }
 0x482   :  { %v987_v7 = vsel %vm967_vm3, %v971_v3, %v976_v4 }
 0x483   :  { %v989_v8 = vsel %vm988_vm6, %v987_v7, %v981_v5 }
 0x484   :  { %v991_v9 = vsel %vm990_vm7, %v989_v8, %v986_v6 }
 0x485   :  { %v992_v10 = vmul.f32 1.442695, %v991_v9 }
 0x487   :  { %1500 = vpow2.f32 %v992_v10 }
 0x491   :  { %v1501_v11 = vpop.eup %1500 }
 0x492   :  { %1354 = vmatmul.mubr.msk.f32.vlgmr.msra.gmra.mrb[6].mxu1 %vm170_vm0, %v1501_v11  ;;  %v1071_v12 = vmul.f32 %v1501_v11, %v991_v9 }
 0x493   :  { %1375 = vmatpush3.bf16.msra.mxu1 %v1368_v48  ;;  %1364 = vmatprep.mubr.msk.f32.mxu1 %vm1714_vm1, %v1713_v0 }
 0x494   :  { %1376 = vmatprep.subr.bf16.mxu1 %v1715_v49 }
 0x497   :  { %1378 = vmatpush3.bf16.msra.mxu1 %v1371_v52 }
 0x49a   :  { %1365 = vmatmul.mubr.msk.f32.vlgmr.msra.gmra.mrb[8].mxu1 %vm170_vm0, %v1071_v12 }
 0x4c0   :  { %v834_v15 = vpop.f32.mrb[4].mxu1 }
 0x4c1   :  { %v838_v16 = vadd.f32 %v834_v15, %v777_v14  ;;  %v1325_v17 = vpop.f32.mrb[5].mxu1 }
 0x4c3   :  { %v839_v18 = vmax.f32 %v838_v16, 0.0 }
 0x4c5   :  { %1343 = vmatmul.mubr.f32.vlgmr.msra.gmra.mrb[4].mxu0 %v839_v18 }
 0x565   :  { %v1067_v19 = vpop.f32.mrb[6].mxu1 }
 0x566   :  { %1502 = vlog2.f32 %v1067_v19  ;;  %v1355_v20 = vpop.f32.mrb[7].mxu1 }
 0x567   :  { %1504 = vrcp.f32 %v1067_v19 }
 0x56d   :  { %v1141_v0 = vpop.f32.mrb[8].mxu1 }
 0x56e   :  { %v1366_v21 = vpop.f32.mrb[9].mxu1 }
 0x570   :  { %v1503_v22 = vpop.eup %1502 }
 0x571   :  { %v1505_v23 = vpop.eup %1504  ;;  %v1146_v24 = vmul.f32 0.6931472, %v1503_v22 }
 0x572   :  { %v1148_v25 = vmul.f32 %v1505_v23, %v1141_v0 }
 0x574   :  { %v1149_v26 = vsub.f32 %v1146_v24, %v1148_v25 }
 0x598   :  { %v945_v27 = vpop.f32.mrb[4].mxu0 }
 0x599   :  { %v946_v28 = vadd.f32 %v1266_v53, %v945_v27  ;;  %v1344_v29 = vpop.f32.mrb[5].mxu0 }
 0x59b   :  { %v956_v30 = vsel %vm955_vm8, %v946_v28, -inf  ;;  %v1275_v42 = vmul.f32 -1.442695, %v946_v28 }
 0x59c   :  { %957 = vmax.xlane.f32.xlu0 %v956_v30 }
 0x629   :  { %v958_v31 = vpop.xlane.xlu0 %957 }
 0x62a   :  { %v959_v32 = vsub.f32 %v946_v28, %v958_v31 }
 0x62c   :  { %v960_v33 = vmul.f32 1.442695, %v959_v32 }
 0x62e   :  { %1506 = vpow2.f32 %v960_v33 }
 0x638   :  { %v1507_v34 = vpop.eup %1506 }
 0x639   :  { %v962_v35 = vsel %vm955_vm8, %v1507_v34, 0.0 }
 0x63a   :  { %963 = vadd.xlane.f32.xlu1 %v962_v35 }
 0x6c7   :  { %v964_v36 = vpop.xlane.xlu1 %963 }
 0x6c8   :  { %1508 = vrcp.f32 %v964_v36 }
 0x6d2   :  { %v1509_v37 = vpop.eup %1508 }
 0x6d3   :  { %v966_v38 = vmul.f32 %v1509_v37, %v1507_v34 }
 0x6d5   :  { %1160 = vrot.lane.b32.xlu1 %v966_v38, %s1716_s11  ;;  %v1150_v39 = vadd.f32 1e-08, %v966_v38 }
 0x6d7   :  { %1510 = vlog2.f32 %v1150_v39 }
 0x6d8   :  { %1512 = vpow2.f32 %v1275_v42 }
 0x6e1   :  { %v1511_v40 = vpop.eup %1510 }
 0x6e2   :  { %v1152_v43 = vmul.f32 0.6931472, %v1511_v40  ;;  %v1513_v48 = vpop.eup %1512 }
 0x6e3   :  { %v952_v49 = vadd.f32 1.0, %v1513_v48 }
 0x6e4   :  { %v1153_v44 = vmul.f32 0.1, %v1152_v43 }
 0x6e5   :  { %1514 = vrcp.f32 %v952_v49 }
 0x6e6   :  { %v1154_v45 = vsub.f32 %v1149_v26, %v1153_v44 }
 0x6e8   :  { %v1155_v46 = vmul.f32 %v1154_v45, %v966_v38 }
 0x6ea   :  { %v1156_v47 = vsel %vm955_vm8, %v1155_v46, 0.0 }
 0x6eb   :  { %1157 = vadd.xlane.f32.xlu0 %v1156_v47 }
 0x6ef   :  { %v1515_v50 = vpop.eup %1514 }
 0x701   :  { %1164 = vrot.lane.b32.xlu0 %v1515_v50, %s1717_s20 }
 0x747   :  { %v1161_v51 = vpop.permute.xlu1 %1160 }
 0x748   :  { %v1167_v54 = vsel %vm170_vm0, %v2050_v41, %v1161_v51 }
 0x778   :  { %v1158_v52 = vpop.xlane.xlu0 %1157 }
 0x779   :  { %v1169_v55 = vsel %vm1168_vm9, %v1167_v54, %v1158_v52 }
 0x77c   :  { %v1165_v56 = vpop.permute.xlu0 %1164 }
 0x77d   :  { %v1171_v57 = vsel %vm1170_vm10, %v1169_v55, %v1165_v56 }
 0x77e   :  { %v1173_v58 = vsel %vm1172_vm11, %v1171_v57, 0.0 }
 0x77f   :  { %1174 = vst [vmem:[#allocation14] sm:$0xff] %v1173_v58 }
 0x780   :  { %1681 = shalt.err (!%p1678_p4)
}
 0x781   :  { %s1682_s25 = scalar_lea.hbm %s2149_s13, 128 }
 0x782   :  { %p1683_p5 = scmp.ne.s32.totalorder %s2149_s13, %s1682_s25  ;;  %p1686_p6 = scmp.lt.u32.totalorder %s1682_s25, %s2149_s13 }
 0x784   :  { %p1688_p7 = pnand %p1686_p6, %p1683_p5 }
 0x786   :  { %1691 = shalt.err (!%p1688_p7)
}
 0x787   :  { %1184 = dma.vmem_to_hbm [thread:$0]  %s1182_s24, 128, %s2149_s13, [#allocation4]  }
 0x788   :  { %1700 = dma.done.wait [#allocation4], 128  }
 0x789   :  { %1701 = vsyncadd [#allocation4], 4294967168 }
 0x78a   :  { %1188 = vsyncpa [#allocation3], 1 }
 0x78b   :  { %1189 = vsyncpa [#allocation6], 1 }
 0x78c   :  { %1190 = vsyncpa [#allocation9], 1 }
 0x78d   :  { %1191 = vsyncpa [#allocation12], 1 }
 0x78e   :  { %1192 = vsyncpa [#allocation4], 1 }

</bundles_post_ra>
